<compile_context>
chip_gen: v7x
topology: tpu7x:2x2x1
jax: 0.10.0
libtpu: 0.0.40
codegen_flags: <defaults>
</compile_context>

<pallas_src>
import functools
import math

import jax
import jax.numpy as jnp
from jax.experimental import pallas as pl
from jax.experimental.pallas import tpu as pltpu


# ----------------------------------------------------------------------------
# Fused kernel: div/curl sums on data + collocation points, and SSE(pred, lab)
# ----------------------------------------------------------------------------
def _pinn_fused_kernel(pts_ref, pred_ref, lab_ref,
                       w1t_ref, b1t_ref, vred_ref, out_ref,
                       *, n_data, data_pad, n_coll):
    w1t = w1t_ref[...]       # (H, 3)
    b1t = b1t_ref[...]       # (H, 1)
    vred = vred_ref[...]     # (4, H)   rows = [div, curl_x, curl_y, curl_z] basis

    pts = pts_ref[...]       # (3, T) -- data lanes [0, n_data), coll lanes
    t = pts.shape[1]         #           [data_pad, data_pad + n_coll)

    # hidden pre-activation via lane-broadcast VPU ops (K=3 is too thin for MXU)
    pre = (w1t[:, 0:1] * pts[0:1, :]
           + w1t[:, 1:2] * pts[1:2, :]
           + w1t[:, 2:3] * pts[2:3, :]
           + b1t)                                          # (H, T)
    h = jnp.tanh(pre)                                      # EUP
    s = 1.0 - h * h                                        # tanh' = 1 - h^2

    # single MXU contraction gives [div, curl_x, curl_y, curl_z] per sample
    d = jnp.dot(vred, s, preferred_element_type=jnp.float32)   # (4, T)
    sq = d * d
    div_row = sq[0:1, :]                                   # (1, T)
    curl_row = sq[1:2, :] + sq[2:3, :] + sq[3:4, :]        # (1, T)

    lane = jax.lax.broadcasted_iota(jnp.int32, (1, t), 1)
    data_mask = lane < n_data
    coll_mask = jnp.logical_and(lane >= data_pad, lane < data_pad + n_coll)

    div_d = jnp.sum(jnp.where(data_mask, div_row, 0.0), axis=1, keepdims=True)
    curl_d = jnp.sum(jnp.where(data_mask, curl_row, 0.0), axis=1, keepdims=True)
    div_f = jnp.sum(jnp.where(coll_mask, div_row, 0.0), axis=1, keepdims=True)
    curl_f = jnp.sum(jnp.where(coll_mask, curl_row, 0.0), axis=1, keepdims=True)

    # SSE(pred, labels): padded lanes are zero in both -> contribute nothing
    diff = pred_ref[...] - lab_ref[...]                    # (3, Np)
    sse = jnp.sum(diff * diff, keepdims=True)              # (1, 1)

    # pack the five sums into lanes 0..4 of a single lane-dense (1,128) block
    lanes = jax.lax.broadcasted_iota(jnp.int32, out_ref.shape, 1)
    out = (jnp.where(lanes == 0, div_d, 0.0)
           + jnp.where(lanes == 1, curl_d, 0.0)
           + jnp.where(lanes == 2, div_f, 0.0)
           + jnp.where(lanes == 3, curl_f, 0.0)
           + jnp.where(lanes == 4, sse, 0.0))
    out_ref[...] = out


def _pad_lanes(x, mult=128):
    """Pad the last (lane) dim of a (rows, n) array up to a multiple of `mult`."""
    n = x.shape[-1]
    pad = (-n) % mult
    if pad:
        x = jnp.pad(x, ((0, 0), (0, pad)))
    return x


def pinn_fused_sums(data_t, coll_t, pred_t, lab_t, w1_t, b1_t, vred_t,
                    *, n_data, n_coll):
    data_p = _pad_lanes(data_t)                    # (3, Dp)
    coll_p = _pad_lanes(coll_t)                    # (3, Cp)
    pts = jnp.concatenate([data_p, coll_p], axis=1)   # (3, Dp + Cp)
    pred_p = _pad_lanes(pred_t)
    lab_p = _pad_lanes(lab_t)
    hdim = w1_t.shape[0]

    def full(shape):
        return pl.BlockSpec(shape, lambda i: (0, 0))

    kernel = functools.partial(_pinn_fused_kernel, n_data=n_data,
                               data_pad=data_p.shape[1], n_coll=n_coll)
    out = pl.pallas_call(
        kernel,
        out_shape=jax.ShapeDtypeStruct((1, 128), jnp.float32),
        grid_spec=pltpu.PrefetchScalarGridSpec(
            num_scalar_prefetch=0,
            grid=(1,),
            in_specs=[
                full(pts.shape),         # (3, Dp+Cp) combined point slab
                full(pred_p.shape),      # (3, Np)
                full(lab_p.shape),       # (3, Np)
                full((hdim, 3)),         # W1^T
                full((hdim, 1)),         # b1^T
                full((4, hdim)),         # reduced Jacobian basis
            ],
            out_specs=full((1, 128)),
        ),
        compiler_params=pltpu.CompilerParams(dimension_semantics=("arbitrary",)),
    )(pts, pred_p, lab_p, w1_t, b1_t, vred_t)
    return out


# ----------------------------------------------------------------------------
# PINN loss (wrapper / glue)
# ----------------------------------------------------------------------------
class PINNLossPallas:
    def __init__(self, N_f, L, addBC, hidden=32, key=jax.random.PRNGKey(42)):
        self.N_f = int(N_f)
        self.L = float(L)
        self.addBC = bool(addBC)
        self.H = int(hidden)
        k1, k2, k3 = jax.random.split(key, 3)
        # deterministic stand-in "model": B = tanh(x @ W1 + b1) @ W2 + b2
        self.W1 = jax.random.normal(k1, (3, hidden), jnp.float32) / math.sqrt(3.0)
        self.b1 = 0.1 * jax.random.normal(k2, (1, hidden), jnp.float32)
        self.W2 = (jax.random.normal(k3, (hidden, 3), jnp.float32)
                   / math.sqrt(float(hidden)))
        self.b2 = jnp.zeros((3,), jnp.float32)   # never enters any Jacobian term

        # transposed, lane-dense parameter layouts for the kernel
        self.W1_T = self.W1.T                    # (H, 3)
        self.b1_T = self.b1.T                    # (H, 1)
        # reduced Jacobian basis (div / curl combinations folded in on host):
        # D = V_red @ s, rows = [div, dBz/dy-dBy/dz, dBx/dz-dBz/dx, dBy/dx-dBx/dy]
        w1, w2 = self.W1, self.W2
        v_div = w1[0, :] * w2[:, 0] + w1[1, :] * w2[:, 1] + w1[2, :] * w2[:, 2]
        v_c1 = w1[1, :] * w2[:, 2] - w1[2, :] * w2[:, 1]
        v_c2 = w1[2, :] * w2[:, 0] - w1[0, :] * w2[:, 2]
        v_c3 = w1[0, :] * w2[:, 1] - w1[1, :] * w2[:, 0]
        self.Vred_T = jnp.stack([v_div, v_c1, v_c2, v_c3], axis=0)   # (4, H)

    def __call__(self, data, pred, labels, key):
        n = data.shape[0]

        # ----- collocation points -----
        # TODO(synk): torch uses non-seeded np.random.default_rng(); replaced by
        # jax.random with an explicit key (deterministic, not bit-matched).
        u = jax.random.uniform(key, (self.N_f, 3), jnp.float32,
                               minval=-0.5, maxval=0.5)
        y_max = jnp.max(data[:, 1])
        scale_x = jnp.where(y_max > 0, jnp.float32(self.L),
                            jnp.float32(self.L / 5.0))
        scales = jnp.stack([scale_x, jnp.float32(self.L), jnp.float32(self.L)])
        coll_t = u.T * scales[:, None]           # (3, N_f), lane-dense

        # ----- single fused kernel launch -----
        sums = pinn_fused_sums(data.T, coll_t, pred.T, labels.T,
                               self.W1_T, self.b1_T, self.Vred_T,
                               n_data=n, n_coll=self.N_f)
        s_div_bc, s_curl_bc = sums[0, 0], sums[0, 1]
        s_div_f, s_curl_f = sums[0, 2], sums[0, 3]
        sse = sums[0, 4]

        loss_BC_div = s_div_bc / jnp.float32(n)
        loss_BC_cul = s_curl_bc / jnp.float32(n)
        f = s_div_f / jnp.float32(self.N_f)
        loss_f = f * f                           # mean(square(scalar)) == f^2
        loss_cross = s_curl_f / jnp.float32(self.N_f)
        loss_u = sse / jnp.float32(n * pred.shape[1])

        if self.addBC:
            loss = loss_f + loss_u + loss_cross + loss_BC_div + loss_BC_cul
        else:
            loss = loss_f + loss_u + loss_cross
        return loss_f, loss_u, loss_cross, loss_BC_div, loss_BC_cul, loss


if __name__ == "__main__":
    key = jax.random.PRNGKey(0)
    k_data, k_pred, k_lab, k_col = jax.random.split(key, 4)

    N, N_f, L, H = 128, 256, 2.0, 32
    data = jax.random.uniform(k_data, (N, 3), jnp.float32, minval=-1.0, maxval=1.0)
    pred = jax.random.normal(k_pred, (N, 3), jnp.float32)
    labels = jax.random.normal(k_lab, (N, 3), jnp.float32)

    loss_mod = PINNLossPallas(N_f=N_f, L=L, addBC=1, hidden=H)
    out = loss_mod(data, pred, labels, k_col)
    out = jax.block_until_ready(out)

    # ----- plain-JAX reference via the full (H,9) Jacobian basis -----
    W1, W2, b1 = loss_mod.W1, loss_mod.W2, loss_mod.b1
    V_full = (W1.T[:, :, None] * W2[:, None, :]).reshape(H, 9)

    def ref_sums(pts):
        h = jnp.tanh(pts @ W1 + b1)
        s = 1.0 - h * h
        J = s @ V_full
        div = J[:, 0] + J[:, 4] + J[:, 8]
        curl = ((J[:, 5] - J[:, 7]) ** 2 + (J[:, 6] - J[:, 2]) ** 2
                + (J[:, 1] - J[:, 3]) ** 2)
        return jnp.sum(div ** 2), jnp.sum(curl)

    rd, rc = ref_sums(data)
    # reproduce the module's collocation points
    u = jax.random.uniform(k_col, (N_f, 3), jnp.float32, minval=-0.5, maxval=0.5)
    scale_x = jnp.where(jnp.max(data[:, 1]) > 0, jnp.float32(L),
                        jnp.float32(L / 5.0))
    pts_f = u * jnp.stack([scale_x, jnp.float32(L), jnp.float32(L)])[None, :]
    rdf, rcf = ref_sums(pts_f)

    ref_bc_div = rd / N
    ref_bc_cul = rc / N
    ref_f = rdf / N_f
    ref_loss_f = ref_f ** 2
    ref_cross = rcf / N_f
    ref_loss_u = jnp.mean((pred - labels) ** 2)
    ref_loss = ref_loss_f + ref_loss_u + ref_cross + ref_bc_div + ref_bc_cul

    loss_f, loss_u, loss_cross, loss_bc_div, loss_bc_cul, loss = out
    assert jnp.allclose(loss_bc_div, ref_bc_div, rtol=1e-2, atol=1e-5)
    assert jnp.allclose(loss_bc_cul, ref_bc_cul, rtol=1e-2, atol=1e-5)
    assert jnp.allclose(loss_f, ref_loss_f, rtol=1e-2, atol=1e-5)
    assert jnp.allclose(loss_cross, ref_cross, rtol=1e-2, atol=1e-5)
    assert jnp.allclose(loss_u, ref_loss_u, rtol=1e-2, atol=1e-5)
    assert jnp.allclose(loss, ref_loss, rtol=1e-2, atol=1e-5)

    print("KERNEL_OK")
</pallas_src>

<mosaic_0001>
module attributes {stable_mosaic.version = 11 : i64} {
  func.func @_pinn_fused_kernel(%arg0: i32, %arg1: memref<3x384xf32, #tpu.memory_space<vmem>>, %arg2: memref<3x128xf32, #tpu.memory_space<vmem>>, %arg3: memref<3x128xf32, #tpu.memory_space<vmem>>, %arg4: memref<32x3xf32, #tpu.memory_space<vmem>>, %arg5: memref<32x1xf32, #tpu.memory_space<vmem>>, %arg6: memref<4x32xf32, #tpu.memory_space<vmem>>, %arg7: memref<1x128xf32, #tpu.memory_space<vmem>>) attributes {dimension_semantics = [#tpu.dimension_semantics<arbitrary>], iteration_bounds = array<i64: 1>, scalar_prefetch = 0 : i64, scratch_operands = 0 : i64, tpu.core_type = #tpu.core_type<tc>, window_params = [{pipeline_mode = #tpu.pipeline_mode<synchronous>, transform_indices = @transform_0, window_bounds = array<i64: 3, 384>}, {pipeline_mode = #tpu.pipeline_mode<synchronous>, transform_indices = @transform_1, window_bounds = array<i64: 3, 128>}, {pipeline_mode = #tpu.pipeline_mode<synchronous>, transform_indices = @transform_2, window_bounds = array<i64: 3, 128>}, {pipeline_mode = #tpu.pipeline_mode<synchronous>, transform_indices = @transform_3, window_bounds = array<i64: 32, 3>}, {pipeline_mode = #tpu.pipeline_mode<synchronous>, transform_indices = @transform_4, window_bounds = array<i64: 32, 1>}, {pipeline_mode = #tpu.pipeline_mode<synchronous>, transform_indices = @transform_5, window_bounds = array<i64: 4, 32>}, {pipeline_mode = #tpu.pipeline_mode<synchronous>, transform_indices = @transform_6, window_bounds = array<i64: 1, 128>}]} {
    %c0 = arith.constant 0 : index
    %c0_0 = arith.constant 0 : index
    %0 = vector.load %arg4[%c0, %c0_0] : memref<32x3xf32, #tpu.memory_space<vmem>>, vector<32x3xf32>
    %c0_1 = arith.constant 0 : index
    %c0_2 = arith.constant 0 : index
    %1 = vector.load %arg5[%c0_1, %c0_2] : memref<32x1xf32, #tpu.memory_space<vmem>>, vector<32x1xf32>
    %c0_3 = arith.constant 0 : index
    %c0_4 = arith.constant 0 : index
    %2 = vector.load %arg6[%c0_3, %c0_4] : memref<4x32xf32, #tpu.memory_space<vmem>>, vector<4x32xf32>
    %c0_5 = arith.constant 0 : index
    %c0_6 = arith.constant 0 : index
    %3 = vector.load %arg1[%c0_5, %c0_6] : memref<3x384xf32, #tpu.memory_space<vmem>>, vector<3x384xf32>
    %4 = vector.extract_strided_slice %0 {offsets = [0, 0], sizes = [32, 1], strides = [1, 1]} : vector<32x3xf32> to vector<32x1xf32>
    %5 = vector.extract_strided_slice %3 {offsets = [0, 0], sizes = [1, 384], strides = [1, 1]} : vector<3x384xf32> to vector<1x384xf32>
    %6 = vector.broadcast %4 : vector<32x1xf32> to vector<32x384xf32>
    %7 = vector.broadcast %5 : vector<1x384xf32> to vector<32x384xf32>
    %8 = arith.mulf %6, %7 : vector<32x384xf32>
    %9 = vector.extract_strided_slice %0 {offsets = [0, 1], sizes = [32, 1], strides = [1, 1]} : vector<32x3xf32> to vector<32x1xf32>
    %10 = vector.extract_strided_slice %3 {offsets = [1, 0], sizes = [1, 384], strides = [1, 1]} : vector<3x384xf32> to vector<1x384xf32>
    %11 = vector.broadcast %9 : vector<32x1xf32> to vector<32x384xf32>
    %12 = vector.broadcast %10 : vector<1x384xf32> to vector<32x384xf32>
    %13 = arith.mulf %11, %12 : vector<32x384xf32>
    %14 = arith.addf %8, %13 : vector<32x384xf32>
    %15 = vector.extract_strided_slice %0 {offsets = [0, 2], sizes = [32, 1], strides = [1, 1]} : vector<32x3xf32> to vector<32x1xf32>
    %16 = vector.extract_strided_slice %3 {offsets = [2, 0], sizes = [1, 384], strides = [1, 1]} : vector<3x384xf32> to vector<1x384xf32>
    %17 = vector.broadcast %15 : vector<32x1xf32> to vector<32x384xf32>
    %18 = vector.broadcast %16 : vector<1x384xf32> to vector<32x384xf32>
    %19 = arith.mulf %17, %18 : vector<32x384xf32>
    %20 = arith.addf %14, %19 : vector<32x384xf32>
    %21 = vector.broadcast %1 : vector<32x1xf32> to vector<32x384xf32>
    %22 = arith.addf %20, %21 : vector<32x384xf32>
    %23 = math.tanh %22 : vector<32x384xf32>
    %24 = arith.mulf %23, %23 : vector<32x384xf32>
    %cst = arith.constant 1.000000e+00 : f32
    %25 = vector.broadcast %cst : f32 to vector<32x384xf32>
    %26 = arith.subf %25, %24 : vector<32x384xf32>
    %cst_7 = arith.constant dense<0.000000e+00> : vector<4x384xf32>
    %27 = tpu.matmul %2, %26, %cst_7 {dimension_numbers = #tpu.dot_dimension_numbers<[1], [0], [0], [1], [0, 0, 1, 1], [], []>} : vector<4x32xf32>, vector<32x384xf32>, vector<4x384xf32> -> vector<4x384xf32>
    %28 = arith.mulf %27, %27 : vector<4x384xf32>
    %29 = vector.extract_strided_slice %28 {offsets = [0, 0], sizes = [1, 384], strides = [1, 1]} : vector<4x384xf32> to vector<1x384xf32>
    %30 = vector.extract_strided_slice %28 {offsets = [1, 0], sizes = [1, 384], strides = [1, 1]} : vector<4x384xf32> to vector<1x384xf32>
    %31 = vector.extract_strided_slice %28 {offsets = [2, 0], sizes = [1, 384], strides = [1, 1]} : vector<4x384xf32> to vector<1x384xf32>
    %32 = arith.addf %30, %31 : vector<1x384xf32>
    %33 = vector.extract_strided_slice %28 {offsets = [3, 0], sizes = [1, 384], strides = [1, 1]} : vector<4x384xf32> to vector<1x384xf32>
    %34 = arith.addf %32, %33 : vector<1x384xf32>
    %35 = tpu.iota {dimensions = array<i32: 1>} : vector<1x384xi32>
    %c128_i32 = arith.constant 128 : i32
    %36 = vector.broadcast %c128_i32 : i32 to vector<1x384xi32>
    %37 = arith.cmpi slt, %35, %36 : vector<1x384xi32>
    %c128_i32_8 = arith.constant 128 : i32
    %38 = vector.broadcast %c128_i32_8 : i32 to vector<1x384xi32>
    %39 = arith.cmpi sge, %35, %38 : vector<1x384xi32>
    %c384_i32 = arith.constant 384 : i32
    %40 = vector.broadcast %c384_i32 : i32 to vector<1x384xi32>
    %41 = arith.cmpi slt, %35, %40 : vector<1x384xi32>
    %42 = arith.andi %39, %41 : vector<1x384xi1>
    %cst_9 = arith.constant 0.000000e+00 : f32
    %43 = vector.broadcast %cst_9 : f32 to vector<1x384xf32>
    %44 = arith.select %37, %29, %43 : vector<1x384xi1>, vector<1x384xf32>
    %cst_10 = arith.constant dense<0.000000e+00> : vector<1xf32>
    %45 = vector.multi_reduction <add>, %44, %cst_10 [1] : vector<1x384xf32> to vector<1xf32>
    %46 = vector.shape_cast %45 : vector<1xf32> to vector<1x1xf32>
    %cst_11 = arith.constant 0.000000e+00 : f32
    %47 = vector.broadcast %cst_11 : f32 to vector<1x384xf32>
    %48 = arith.select %37, %34, %47 : vector<1x384xi1>, vector<1x384xf32>
    %cst_12 = arith.constant dense<0.000000e+00> : vector<1xf32>
    %49 = vector.multi_reduction <add>, %48, %cst_12 [1] : vector<1x384xf32> to vector<1xf32>
    %50 = vector.shape_cast %49 : vector<1xf32> to vector<1x1xf32>
    %cst_13 = arith.constant 0.000000e+00 : f32
    %51 = vector.broadcast %cst_13 : f32 to vector<1x384xf32>
    %52 = arith.select %42, %29, %51 : vector<1x384xi1>, vector<1x384xf32>
    %cst_14 = arith.constant dense<0.000000e+00> : vector<1xf32>
    %53 = vector.multi_reduction <add>, %52, %cst_14 [1] : vector<1x384xf32> to vector<1xf32>
    %54 = vector.shape_cast %53 : vector<1xf32> to vector<1x1xf32>
    %cst_15 = arith.constant 0.000000e+00 : f32
    %55 = vector.broadcast %cst_15 : f32 to vector<1x384xf32>
    %56 = arith.select %42, %34, %55 : vector<1x384xi1>, vector<1x384xf32>
    %cst_16 = arith.constant dense<0.000000e+00> : vector<1xf32>
    %57 = vector.multi_reduction <add>, %56, %cst_16 [1] : vector<1x384xf32> to vector<1xf32>
    %58 = vector.shape_cast %57 : vector<1xf32> to vector<1x1xf32>
    %c0_17 = arith.constant 0 : index
    %c0_18 = arith.constant 0 : index
    %59 = vector.load %arg2[%c0_17, %c0_18] : memref<3x128xf32, #tpu.memory_space<vmem>>, vector<3x128xf32>
    %c0_19 = arith.constant 0 : index
    %c0_20 = arith.constant 0 : index
    %60 = vector.load %arg3[%c0_19, %c0_20] : memref<3x128xf32, #tpu.memory_space<vmem>>, vector<3x128xf32>
    %61 = arith.subf %59, %60 : vector<3x128xf32>
    %62 = arith.mulf %61, %61 : vector<3x128xf32>
    %63 = vector.shape_cast %62 : vector<3x128xf32> to vector<1x3x128xf32>
    %cst_21 = arith.constant dense<0.000000e+00> : vector<1xf32>
    %64 = vector.multi_reduction <add>, %63, %cst_21 [1, 2] : vector<1x3x128xf32> to vector<1xf32>
    %65 = vector.shape_cast %64 : vector<1xf32> to vector<1x1x1xf32>
    %66 = vector.extract %65[0, 0, 0] : f32 from vector<1x1x1xf32>
    %67 = vector.broadcast %66 : f32 to vector<1x1xf32>
    %68 = tpu.iota {dimensions = array<i32: 1>} : vector<1x128xi32>
    %c0_i32 = arith.constant 0 : i32
    %69 = vector.broadcast %c0_i32 : i32 to vector<1x128xi32>
    %70 = arith.cmpi eq, %68, %69 : vector<1x128xi32>
    %cst_22 = arith.constant 0.000000e+00 : f32
    %71 = vector.shape_cast %46 : vector<1x1xf32> to vector<1x1xf32>
    %72 = vector.broadcast %71 : vector<1x1xf32> to vector<1x128xf32>
    %73 = vector.broadcast %cst_22 : f32 to vector<1x128xf32>
    %74 = arith.select %70, %72, %73 : vector<1x128xi1>, vector<1x128xf32>
    %c1_i32 = arith.constant 1 : i32
    %75 = vector.broadcast %c1_i32 : i32 to vector<1x128xi32>
    %76 = arith.cmpi eq, %68, %75 : vector<1x128xi32>
    %cst_23 = arith.constant 0.000000e+00 : f32
    %77 = vector.shape_cast %50 : vector<1x1xf32> to vector<1x1xf32>
    %78 = vector.broadcast %77 : vector<1x1xf32> to vector<1x128xf32>
    %79 = vector.broadcast %cst_23 : f32 to vector<1x128xf32>
    %80 = arith.select %76, %78, %79 : vector<1x128xi1>, vector<1x128xf32>
    %81 = arith.addf %74, %80 : vector<1x128xf32>
    %c2_i32 = arith.constant 2 : i32
    %82 = vector.broadcast %c2_i32 : i32 to vector<1x128xi32>
    %83 = arith.cmpi eq, %68, %82 : vector<1x128xi32>
    %cst_24 = arith.constant 0.000000e+00 : f32
    %84 = vector.shape_cast %54 : vector<1x1xf32> to vector<1x1xf32>
    %85 = vector.broadcast %84 : vector<1x1xf32> to vector<1x128xf32>
    %86 = vector.broadcast %cst_24 : f32 to vector<1x128xf32>
    %87 = arith.select %83, %85, %86 : vector<1x128xi1>, vector<1x128xf32>
    %88 = arith.addf %81, %87 : vector<1x128xf32>
    %c3_i32 = arith.constant 3 : i32
    %89 = vector.broadcast %c3_i32 : i32 to vector<1x128xi32>
    %90 = arith.cmpi eq, %68, %89 : vector<1x128xi32>
    %cst_25 = arith.constant 0.000000e+00 : f32
    %91 = vector.shape_cast %58 : vector<1x1xf32> to vector<1x1xf32>
    %92 = vector.broadcast %91 : vector<1x1xf32> to vector<1x128xf32>
    %93 = vector.broadcast %cst_25 : f32 to vector<1x128xf32>
    %94 = arith.select %90, %92, %93 : vector<1x128xi1>, vector<1x128xf32>
    %95 = arith.addf %88, %94 : vector<1x128xf32>
    %c4_i32 = arith.constant 4 : i32
    %96 = vector.broadcast %c4_i32 : i32 to vector<1x128xi32>
    %97 = arith.cmpi eq, %68, %96 : vector<1x128xi32>
    %cst_26 = arith.constant 0.000000e+00 : f32
    %98 = vector.shape_cast %67 : vector<1x1xf32> to vector<1x1xf32>
    %99 = vector.broadcast %98 : vector<1x1xf32> to vector<1x128xf32>
    %100 = vector.broadcast %cst_26 : f32 to vector<1x128xf32>
    %101 = arith.select %97, %99, %100 : vector<1x128xi1>, vector<1x128xf32>
    %102 = arith.addf %95, %101 : vector<1x128xf32>
    %c0_27 = arith.constant 0 : index
    %c0_28 = arith.constant 0 : index
    %103 = vector.load %arg7[%c0_27, %c0_28] : memref<1x128xf32, #tpu.memory_space<vmem>>, vector<1x128xf32>
    tpu.vector_store %arg7[%c0_27, %c0_28], %102 {strides = array<i32>} : memref<1x128xf32, #tpu.memory_space<vmem>>, vector<1x128xf32>,
    return
  }
  func.func @transform_0(%arg0: i32) -> (i32, i32) {
    %c0_i32 = arith.constant 0 : i32
    %c0_i32_0 = arith.constant 0 : i32
    %c0_i32_1 = arith.constant 0 : i32
    return %c0_i32, %c0_i32_0 : i32, i32
  }
  func.func @transform_1(%arg0: i32) -> (i32, i32) {
    %c0_i32 = arith.constant 0 : i32
    %c0_i32_0 = arith.constant 0 : i32
    %c0_i32_1 = arith.constant 0 : i32
    return %c0_i32, %c0_i32_0 : i32, i32
  }
  func.func @transform_2(%arg0: i32) -> (i32, i32) {
    %c0_i32 = arith.constant 0 : i32
    %c0_i32_0 = arith.constant 0 : i32
    %c0_i32_1 = arith.constant 0 : i32
    return %c0_i32, %c0_i32_0 : i32, i32
  }
  func.func @transform_3(%arg0: i32) -> (i32, i32) {
    %c0_i32 = arith.constant 0 : i32
    %c0_i32_0 = arith.constant 0 : i32
    %c0_i32_1 = arith.constant 0 : i32
    return %c0_i32, %c0_i32_0 : i32, i32
  }
  func.func @transform_4(%arg0: i32) -> (i32, i32) {
    %c0_i32 = arith.constant 0 : i32
    %c0_i32_0 = arith.constant 0 : i32
    %c0_i32_1 = arith.constant 0 : i32
    return %c0_i32, %c0_i32_0 : i32, i32
  }
  func.func @transform_5(%arg0: i32) -> (i32, i32) {
    %c0_i32 = arith.constant 0 : i32
    %c0_i32_0 = arith.constant 0 : i32
    %c0_i32_1 = arith.constant 0 : i32
    return %c0_i32, %c0_i32_0 : i32, i32
  }
  func.func @transform_6(%arg0: i32) -> (i32, i32) {
    %c0_i32 = arith.constant 0 : i32
    %c0_i32_0 = arith.constant 0 : i32
    %c0_i32_1 = arith.constant 0 : i32
    return %c0_i32, %c0_i32_0 : i32, i32
  }
}

</mosaic_0001>

<bundles_post_ra>
// kernel: tpu_custom_call.1
= control target key start
LH: loop header
LB: loop body
LE: loop exit
PB: predicated region body
PF: predicated region fallthrough
CT: control target
= control target key end

     0   :  { %v673_v1 = vmov 2   ;;  %v674_v2 = vmov 1   ;;  %s793_s0 = inlined_call_operand.vmem [shape: f32[3,384], index: 0, kind: input, shape index: {}]   ;;  %s794_s1 = inlined_call_operand.vmem [shape: f32[3,128], index: 1, kind: input, shape index: {}]   ;;  %s795_s2 = inlined_call_operand.vmem [shape: f32[3,128], index: 2, kind: input, shape index: {}]   ;;  %s796_s3 = inlined_call_operand.vmem [shape: f32[32,3], index: 3, kind: input, shape index: {}]   ;;  %s797_s4 = inlined_call_operand.vmem [shape: f32[32,1], index: 4, kind: input, shape index: {}]   ;;  %s798_s5 = inlined_call_operand.vmem [shape: f32[4,32], index: 5, kind: input, shape index: {}]   ;;  %s799_s6 = inlined_call_operand.hbm [shape: f32[1,128], index: 6, kind: output, shape index: {}]  }
   0x1   :  { %v24_v0 = vld [vmem:[%s796_s3] sm:$0xff]  ;;  %618 = vset.pattern.permute.xlu0 %v673_v1  ;;  %617 = vset.pattern.permute.xlu1 %v674_v2  ;;  %v26_v3 = vld [vmem:[%s796_s3 + $0x10] sm:$0xff]  ;;  %v25_v4 = vld [vmem:[%s796_s3 + $0x8] sm:$0xff] }
   0x2   :  { %164 = vperm.xlu0 %618, %v24_v0   ;;  %97 = vperm.xlu1 %617, %v24_v0  }
   0x3   :  { %11 = vsyncpa [#allocation3], 0  ;;  %v675_v5 = vmov 0   ;;  %v27_v6 = vld [vmem:[%s796_s3 + $0x18] sm:$0xff]  ;;  %v29_v7 = vld [vmem:[%s797_s4 + $0x8] sm:$0xff]  ;;  %v676_v11 = vmov 0.0|0.0   ;;  %v57_v20 = vlaneseq }
   0x4   :  { %v28_v8 = vld [vmem:[%s797_s4] sm:$0xff]  ;;  %v30_v9 = vld [vmem:[%s797_s4 + $0x10] sm:$0xff]  ;;  %v31_v10 = vld [vmem:[%s797_s4 + $0x18] sm:$0xff]  ;;  %602 = vmatprep.subr.bf16.mxu1 %v676_v11  ;;  %v677_v12 = vmov 0.0   ;;  %vm678_vm0 = vmmov 0   ;;  %vm529_vm1 = vcmask 1042432  }
   0x5   :  { %366 = vmatprep.mubr.f32.mxu0 %v677_v12  ;;  %591 = vmatprep.mubr.msk.f32.mxu1 %vm678_vm0, %v677_v12  ;;  %v525_v13 = vld [vmem:[%s794_s1] sm:$0x7]  ;;  %v58_v23 = vshrl.u32 %v57_v20, 7  ;;  %v34_v31 = vld [vmem:[%s793_s0 + $0x8] sm:$0x7]  ;;  %vm298_vm2 = vcmask 261120  }
   0x6   :  { %172 = vperm.xlu0 %618, %v26_v3   ;;  %101 = vperm.xlu1 %617, %v25_v4   ;;  %v526_v14 = vld [vmem:[%s795_s2] sm:$0x7]  ;;  %vm486_vm3 = vcmask 1040384   ;;  %vm497_vm4 = vcmask 1041409   ;;  %s679_s18 = smov [#allocation2]  }
   0x7   :  { %v527_v15 = vsub.f32 %v525_v13, %v526_v14  ;;  %v59_v24 = vsub.s32 0, %v58_v23  ;;  %v63_v25 = vsub.s32 4, %v58_v23  ;;  %v114_v28 = vsub.s32 1, %v58_v23  ;;  %v33_v29 = vld [vmem:[%s793_s0] sm:$0x77]  ;;  %s568_s19 = sshll.u32 %s679_s18, 4  ;;  %s569_s19 = int_to_ptr.vmem [resolvable:$true] %s568_s19 }
   0x8   :  { %v118_v30 = vsub.s32 5, %v58_v23  ;;  %v181_v32 = vsub.s32 2, %v58_v23  ;;  %v185_v34 = vsub.s32 6, %v58_v23  ;;  %s649_s20 = scalar_lea.vmem %s569_s19, 16  ;;  %s653_s21 = scalar_lea.vmem %s569_s19, 32 }
   0x9   :  { %v528_v16 = vmul.f32 %v527_v15, %v527_v15  ;;  %v60_v33 = vrot.slane %v33_v29, %v59_v24  ;;  %v64_v35 = vrot.slane %v33_v29, %v63_v25  ;;  %v115_v37 = vrot.slane %v33_v29, %v114_v28  ;;  %p650_p0 = scmp.ne.s32.totalorder %s569_s19, %s649_s20  ;;  %p654_p1 = scmp.lt.s32.totalorder %s569_s19, %s569_s19 }
   0xa   :  { %622 = vset.pattern.permute.xlu0 %v675_v5  ;;  %619 = vset.pattern.permute.xlu1 %v673_v1  ;;  %v68_v38 = vrot.slane %v34_v31, %v59_v24  ;;  %v119_v40 = vrot.slane %v33_v29, %v118_v30  ;;  %v123_v41 = vrot.slane %v34_v31, %v114_v28  ;;  %p655_p2 = scmp.lt.s32.totalorder %s653_s21, %s649_s20 }
   0xb   :  { %37 = vperm.xlu0 %622, %v24_v0   ;;  %168 = vperm.xlu1 %619, %v25_v4   ;;  %v530_v17 = vsel %vm529_vm1, %v528_v16, 0.0  ;;  %v182_v42 = vrot.slane %v33_v29, %v181_v32  ;;  %v75_v43 = vrot.slane %v60_v33, %v59_v24  ;;  %v186_v44 = vrot.slane %v33_v29, %v185_v34 }
   0xc   :  { %v190_v45 = vrot.slane %v34_v31, %v181_v32  ;;  %v79_v46 = vrot.slane %v64_v35, %v59_v24  ;;  %v130_v47 = vrot.slane %v115_v37, %v114_v28  ;;  %v83_v48 = vrot.slane %v68_v38, %v59_v24  ;;  %p656_p3 = por %p655_p2, %p654_p1 }
   0xd   :  { %v134_v50 = vrot.slane %v119_v40, %v114_v28  ;;  %v138_v51 = vrot.slane %v123_v41, %v114_v28  ;;  %v755_v55 = vrot.slane %v182_v42, %v181_v32  ;;  %v757_v58 = vrot.slane %v186_v44, %v181_v32 }
   0xe   :  { %v759_v59 = vrot.slane %v190_v45, %v181_v32  ;;  %p657_p4 = pnand %p656_p3, %p650_p0 }
   0xf   :  { %42 = vperm.xlu0 %622, %v25_v4   ;;  %620 = vset.pattern.permute.xlu1 %v675_v5 }
  0x10   :  { %47 = vperm.xlu1 %620, %v26_v3  }
  0x13   :  { %52 = vperm.xlu0 %622, %v27_v6  }
  0x14   :  { %621 = vset.pattern.permute.xlu1 %v674_v2 }
  0x15   :  { %105 = vperm.xlu1 %621, %v26_v3  }
  0x17   :  { %237 = vperm.xlu0 %622, %v29_v7  }
  0x19   :  { %109 = vperm.xlu1 %621, %v27_v6  }
  0x1d   :  { %623 = vset.pattern.permute.xlu1 %v673_v1 }
  0x1e   :  { %176 = vperm.xlu1 %623, %v27_v6  }
  0x22   :  { %624 = vset.pattern.permute.xlu1 %v675_v5 }
  0x23   :  { %232 = vperm.xlu1 %624, %v28_v8  }
  0x27   :  { %242 = vperm.xlu1 %624, %v30_v9  }
  0x2b   :  { %247 = vperm.xlu1 %624, %v31_v10  }
  0x36   :  { %531 = vadd.xlane.f32.xlu0 %v530_v17 }
  0x81   :  { %v98_v18 = vpop.permute.xlu1 %97  ;;  %v165_v19 = vpop.permute.xlu0 %164 }
  0x82   :  { %v139_v2 = vmul.f32 %v130_v47, %v98_v18  ;;  %v140_v3 = vmul.f32 %v134_v50, %v98_v18  ;;  %v141_v6 = vmul.f32 %v138_v51, %v98_v18  ;;  %v206_v7 = vmul.f32 %v755_v55, %v165_v19 }
  0x83   :  { %v207_v10 = vmul.f32 %v757_v58, %v165_v19  ;;  %v208_v12 = vmul.f32 %v759_v59, %v165_v19 }
  0x85   :  { %v102_v21 = vpop.permute.xlu1 %101  ;;  %v746_v22 = vpop.permute.xlu0 %172 }
  0x86   :  { %v142_v56 = vmul.f32 %v130_v47, %v102_v21  ;;  %v143_v60 = vmul.f32 %v134_v50, %v102_v21  ;;  %v144_v61 = vmul.f32 %v138_v51, %v102_v21  ;;  %v212_v28 = vmul.f32 %v755_v55, %v746_v22 }
  0x87   :  { %v213_v29 = vmul.f32 %v757_v58, %v746_v22  ;;  %v214_v35 = vmul.f32 %v759_v59, %v746_v22 }
  0x8a   :  { %v38_v26 = vpop.permute.xlu0 %37  ;;  %v169_v27 = vpop.permute.xlu1 %168 }
  0x8b   :  { %v84_v62 = vmul.f32 %v75_v43, %v38_v26  ;;  %v85_v63 = vmul.f32 %v79_v46, %v38_v26  ;;  %v86_v0 = vmul.f32 %v83_v48, %v38_v26  ;;  %v209_v8 = vmul.f32 %v755_v55, %v169_v27 }
  0x8c   :  { %v210_v13 = vmul.f32 %v757_v58, %v169_v27  ;;  %v211_v14 = vmul.f32 %v759_v59, %v169_v27 }
  0x8d   :  { %v151_v16 = vadd.f32 %v139_v2, %v84_v62  ;;  %v152_v17 = vadd.f32 %v140_v3, %v85_v63  ;;  %v153_v21 = vadd.f32 %v141_v6, %v86_v0 }
  0x8e   :  { %v43_v36 = vpop.permute.xlu0 %42 }
  0x8f   :  { %v48_v39 = vpop.permute.xlu1 %47  ;;  %v87_v49 = vmul.f32 %v75_v43, %v43_v36  ;;  %v88_v52 = vmul.f32 %v79_v46, %v43_v36  ;;  %v89_v57 = vmul.f32 %v83_v48, %v43_v36  ;;  %v218_v37 = vadd.f32 %v206_v7, %v151_v16 }
  0x90   :  { %v90_v32 = vmul.f32 %v75_v43, %v48_v39  ;;  %v91_v27 = vmul.f32 %v79_v46, %v48_v39  ;;  %v92_v33 = vmul.f32 %v83_v48, %v48_v39  ;;  %v219_v38 = vadd.f32 %v207_v10, %v152_v17 }
  0x91   :  { %v154_v1 = vadd.f32 %v142_v56, %v87_v49  ;;  %v155_v4 = vadd.f32 %v143_v60, %v88_v52  ;;  %v156_v9 = vadd.f32 %v144_v61, %v89_v57  ;;  %v220_v44 = vadd.f32 %v208_v12, %v153_v21 }
  0x92   :  { %v53_v53 = vpop.permute.xlu0 %52 }
  0x93   :  { %v221_v23 = vadd.f32 %v209_v8, %v154_v1  ;;  %v222_v26 = vadd.f32 %v210_v13, %v155_v4  ;;  %v223_v19 = vadd.f32 %v211_v14, %v156_v9  ;;  %v93_v45 = vmul.f32 %v75_v43, %v53_v53 }
  0x94   :  { %v106_v54 = vpop.permute.xlu1 %105  ;;  %v94_v49 = vmul.f32 %v79_v46, %v53_v53  ;;  %v95_v52 = vmul.f32 %v83_v48, %v53_v53 }
  0x95   :  { %v145_v24 = vmul.f32 %v130_v47, %v106_v54  ;;  %v146_v18 = vmul.f32 %v134_v50, %v106_v54  ;;  %v147_v25 = vmul.f32 %v138_v51, %v106_v54 }
  0x96   :  { %v238_v15 = vpop.permute.xlu0 %237 }
  0x97   :  { %v253_v30 = vadd.f32 %v238_v15, %v221_v23  ;;  %v254_v34 = vadd.f32 %v238_v15, %v222_v26  ;;  %v255_v36 = vadd.f32 %v238_v15, %v223_v19  ;;  %v157_v40 = vadd.f32 %v145_v24, %v90_v32 }
  0x98   :  { %v110_v5 = vpop.permute.xlu1 %109  ;;  %v158_v41 = vadd.f32 %v146_v18, %v91_v27  ;;  %v159_v42 = vadd.f32 %v147_v25, %v92_v33 }
  0x99   :  { %625 = vtanh.f32 %v253_v30  ;;  %v148_v54 = vmul.f32 %v130_v47, %v110_v5  ;;  %v149_v56 = vmul.f32 %v134_v50, %v110_v5  ;;  %v150_v57 = vmul.f32 %v138_v51, %v110_v5 }
  0x9a   :  { %627 = vtanh.f32 %v254_v34  ;;  %v224_v62 = vadd.f32 %v212_v28, %v157_v40  ;;  %v225_v63 = vadd.f32 %v213_v29, %v158_v41  ;;  %v226_v0 = vadd.f32 %v214_v35, %v159_v42 }
  0x9b   :  { %629 = vtanh.f32 %v255_v36  ;;  %v160_v46 = vadd.f32 %v148_v54, %v93_v45  ;;  %v161_v48 = vadd.f32 %v149_v56, %v94_v49  ;;  %v162_v47 = vadd.f32 %v150_v57, %v95_v52 }
  0x9d   :  { %v177_v31 = vpop.permute.xlu1 %176 }
  0x9e   :  { %v215_v1 = vmul.f32 %v755_v55, %v177_v31  ;;  %v216_v2 = vmul.f32 %v757_v58, %v177_v31  ;;  %v217_v43 = vmul.f32 %v759_v59, %v177_v31 }
  0xa0   :  { %v227_v4 = vadd.f32 %v215_v1, %v160_v46  ;;  %v228_v5 = vadd.f32 %v216_v2, %v161_v48  ;;  %v229_v6 = vadd.f32 %v217_v43, %v162_v47 }
  0xa2   :  { %v233_v39 = vpop.permute.xlu1 %232 }
  0xa3   :  { %v250_v60 = vadd.f32 %v233_v39, %v218_v37  ;;  %v251_v61 = vadd.f32 %v233_v39, %v219_v38  ;;  %v252_v22 = vadd.f32 %v233_v39, %v220_v44  ;;  %v626_v7 = vpop.eup %625 }
  0xa4   :  { %v628_v9 = vpop.eup %627  ;;  %v277_v12 = vmul.f32 %v626_v7, %v626_v7 }
  0xa5   :  { %631 = vtanh.f32 %v250_v60  ;;  %v630_v10 = vpop.eup %629  ;;  %v278_v14 = vmul.f32 %v628_v9, %v628_v9 }
  0xa6   :  { %633 = vtanh.f32 %v251_v61  ;;  %v243_v50 = vpop.permute.xlu1 %242  ;;  %v279_v16 = vmul.f32 %v630_v10, %v630_v10  ;;  %v289_v25 = vsub.f32 1.0, %v277_v12 }
  0xa7   :  { %635 = vtanh.f32 %v252_v22  ;;  %v256_v51 = vadd.f32 %v243_v50, %v224_v62  ;;  %v257_v53 = vadd.f32 %v243_v50, %v225_v63  ;;  %v258_v3 = vadd.f32 %v243_v50, %v226_v0  ;;  %v32_v62 = vld [vmem:[%s798_s5] sm:$0xf] }
  0xa8   :  { %v290_v29 = vsub.f32 1.0, %v278_v14  ;;  %v291_v31 = vsub.f32 1.0, %v279_v16 }
  0xa9   :  { %637 = vtanh.f32 %v256_v51 }
  0xaa   :  { %639 = vtanh.f32 %v257_v53  ;;  %v248_v55 = vpop.permute.xlu1 %247 }
  0xab   :  { %641 = vtanh.f32 %v258_v3  ;;  %v259_v58 = vadd.f32 %v248_v55, %v227_v4  ;;  %v260_v59 = vadd.f32 %v248_v55, %v228_v5  ;;  %v261_v8 = vadd.f32 %v248_v55, %v229_v6 }
  0xad   :  { %643 = vtanh.f32 %v259_v58 }
  0xae   :  { %645 = vtanh.f32 %v260_v59 }
  0xaf   :  { %v632_v13 = vpop.eup %631  ;;  %647 = vtanh.f32 %v261_v8 }
  0xb0   :  { %v634_v15 = vpop.eup %633  ;;  %v274_v17 = vmul.f32 %v632_v13, %v632_v13 }
  0xb1   :  { %v636_v21 = vpop.eup %635  ;;  %v275_v23 = vmul.f32 %v634_v15, %v634_v15 }
  0xb2   :  { %v276_v24 = vmul.f32 %v636_v21, %v636_v21  ;;  %v286_v18 = vsub.f32 1.0, %v274_v17 }
  0xb3   :  { %v638_v26 = vpop.eup %637  ;;  %v287_v28 = vsub.f32 1.0, %v275_v23 }
  0xb4   :  { %v640_v19 = vpop.eup %639  ;;  %v288_v30 = vsub.f32 1.0, %v276_v24  ;;  %v596_v32 = vpack.c.bf16 %v289_v25, %v286_v18  ;;  %v280_v35 = vmul.f32 %v638_v26, %v638_v26  ;;  %v468_v26 = vand.u32 127, %v57_v20 }
  0xb5   :  { %v642_v27 = vpop.eup %641  ;;  %v594_v33 = vpack.c.bf16 %v290_v29, %v287_v28  ;;  %v281_v37 = vmul.f32 %v640_v19, %v640_v19 }
  0xb6   :  { %v603_v34 = vpack.c.bf16 %v291_v31, %v288_v30  ;;  %v282_v40 = vmul.f32 %v642_v27, %v642_v27  ;;  %v292_v49 = vsub.f32 1.0, %v280_v35  ;;  %vm542_vm5 = vcmp.eq.s32.totalorder %v468_v26, 1 }
  0xb7   :  { %v644_v36 = vpop.eup %643  ;;  %595 = vmatprep.subr.bf16.mxu0 %v594_v33  ;;  %v293_v54 = vsub.f32 1.0, %v281_v37  ;;  %vm540_vm6 = vcmp.eq.s32.totalorder %v468_v26, 0  ;;  %vm548_vm7 = vcmp.eq.s32.totalorder %v468_v26, 2  ;;  %vm551_vm8 = vcmp.eq.s32.totalorder %v468_v26, 3 }
  0xb8   :  { %v646_v38 = vpop.eup %645  ;;  %604 = vmatpush3.bf16.msra.mxu1 %v603_v34  ;;  %597 = vmatpush1.bf16.msra.mxu0 %v596_v32  ;;  %v283_v41 = vmul.f32 %v644_v36, %v644_v36  ;;  %v294_v57 = vsub.f32 1.0, %v282_v40  ;;  %vm557_vm9 = vcmp.eq.s32.totalorder %v468_v26, 4 }
  0xb9   :  { %v648_v42 = vpop.eup %647  ;;  %605 = vmatprep.subr.bf16.mxu1 %v676_v11  ;;  %v284_v44 = vmul.f32 %v646_v38, %v646_v38 }
  0xba   :  { %v285_v45 = vmul.f32 %v648_v42, %v648_v42  ;;  %v295_v52 = vsub.f32 1.0, %v283_v41 }
  0xbb   :  { %v296_v56 = vsub.f32 1.0, %v284_v44 }
  0xbc   :  { %v297_v39 = vsub.f32 1.0, %v285_v45  ;;  %v600_v60 = vpack.c.bf16 %v295_v52, %v292_v49 }
  0xbd   :  { %v598_v61 = vpack.c.bf16 %v296_v56, %v293_v54 }
  0xbe   :  { %v606_v22 = vpack.c.bf16 %v297_v39, %v294_v57 }
  0xbf   :  { %599 = vmatprep.subr.bf16.mxu0 %v598_v61 }
  0xc0   :  { %607 = vmatpush3.bf16.msra.mxu1 %v606_v22  ;;  %601 = vmatpush1.bf16.msra.mxu0 %v600_v60 }
  0xc3   :  { %576 = vmatmul.mubr.msk.f32.vlgmr.msra.gmra.mrb[0].mxu0 %vm298_vm2, %v32_v62  ;;  %592 = vmatmul.mubr.msk.f32.vlgmr.msra.gmra.mrb[0].mxu1 %vm298_vm2, %v32_v62  ;;  %v532_v11 = vpop.xlane.xlu0 %531 }
  0xc4   :  { %v533_v63 = vrot.slane %v532_v11, 4 }
  0xc6   :  { %v534_v0 = vadd.f32 %v533_v63, %v532_v11 }
  0xc8   :  { %v535_v1 = vrot.slane %v534_v0, 2 }
  0xca   :  { %v536_v2 = vadd.f32 %v535_v1, %v534_v0 }
  0xcc   :  { %v537_v43 = vrot.slane %v536_v2, 1 }
  0xce   :  { %v538_v46 = vadd.f32 %v537_v43, %v536_v2 }
  0xd0   :  { %608 = vpush %v538_v46 }
 0x101   :  { %s609_s5 = spop %608 }
 0x102   :  { %v558_v36 = vstv %s609_s5 }
 0x103   :  { %v559_v40 = vsel %vm557_vm9, %v558_v36, 0.0 }
 0x196   :  { %v368_v48 = vpop.f32.mrb[0].mxu0  ;;  %v439_v47 = vpop.f32.mrb[0].mxu1 }
 0x197   :  { %v443_v50 = vmul.f32 %v368_v48, %v368_v48  ;;  %v445_v51 = vmul.f32 %v439_v47, %v439_v47  ;;  %v370_v53 = vpop.f32.mrb[1].mxu0  ;;  %v593_v3 = vpop.f32.mrb[1].mxu1 }
 0x198   :  { %v444_v4 = vmul.f32 %v370_v53, %v370_v53 }
 0x199   :  { %v487_v5 = vsel %vm486_vm3, %v443_v50, 0.0  ;;  %v511_v6 = vsel %vm486_vm3, %v445_v51, 0.0  ;;  %v449_v55 = vrot.slane %v443_v50, 1  ;;  %v451_v59 = vrot.slane %v445_v51, 1 }
 0x19a   :  { %v450_v7 = vrot.slane %v444_v4, 1  ;;  %492 = vadd.xlane.f32.xlu0 %v487_v5  ;;  %v509_v58 = vsel %vm486_vm3, %v444_v4, 0.0  ;;  %v458_v10 = vrot.slane %v443_v50, 2  ;;  %v460_v12 = vrot.slane %v445_v51, 2 }
 0x19b   :  { %v512_v8 = vadd.f32 %v511_v6, %v509_v58  ;;  %v455_v9 = vadd.f32 %v449_v55, %v443_v50  ;;  %v457_v14 = vadd.f32 %v451_v59, %v445_v51  ;;  %v459_v15 = vrot.slane %v444_v4, 2 }
 0x19c   :  { %v456_v13 = vadd.f32 %v450_v7, %v444_v4 }
 0x19d   :  { %v464_v16 = vadd.f32 %v458_v10, %v455_v9  ;;  %v466_v21 = vadd.f32 %v460_v12, %v457_v14 }
 0x19e   :  { %513 = vadd.xlane.f32.xlu0 %v512_v8  ;;  %v465_v17 = vadd.f32 %v459_v15, %v456_v13 }
 0x19f   :  { %v498_v23 = vsel %vm497_vm4, %v464_v16, 0.0  ;;  %v521_v18 = vsel %vm497_vm4, %v466_v21, 0.0 }
 0x1a0   :  { %503 = vadd.xlane.f32.xlu1 %v498_v23  ;;  %v519_v24 = vsel %vm497_vm4, %v465_v17, 0.0 }
 0x1a1   :  { %v522_v25 = vadd.f32 %v521_v18, %v519_v24 }
 0x1a4   :  { %523 = vadd.xlane.f32.xlu1 %v522_v25 }
 0x227   :  { %v493_v28 = vpop.xlane.xlu0 %492 }
 0x228   :  { %v541_v32 = vsel %vm540_vm6, %v493_v28, 0.0 }
 0x22b   :  { %v514_v30 = vpop.xlane.xlu0 %513 }
 0x22c   :  { %v549_v34 = vsel %vm548_vm7, %v514_v30, 0.0 }
 0x22d   :  { %v504_v29 = vpop.xlane.xlu1 %503 }
 0x22e   :  { %v543_v19 = vsel %vm542_vm5, %v504_v29, 0.0 }
 0x22f   :  { %v545_v31 = vrot.slane %v543_v19, 1 }
 0x231   :  { %v547_v27 = vadd.f32 %v545_v31, %v541_v32  ;;  %v524_v33 = vpop.xlane.xlu1 %523 }
 0x232   :  { %v552_v35 = vsel %vm551_vm8, %v524_v33, 0.0 }
 0x233   :  { %v550_v37 = vadd.f32 %v549_v34, %v547_v27  ;;  %v554_v38 = vrot.slane %v552_v35, 1 }
 0x235   :  { %v556_v20 = vadd.f32 %v554_v38, %v550_v37 }
 0x237   :  { %v560_v41 = vadd.f32 %v559_v40, %v556_v20 }
 0x239   :  { %561 = vst [vmem:[#allocation2] sm:$0x1] %v560_v41 }
 0x23a   :  { %660 = shalt.err (!%p657_p4)
}
 0x23b   :  { %s661_s24 = scalar_lea.hbm %s799_s6, 16 }
 0x23c   :  { %p662_p5 = scmp.ne.s32.totalorder %s799_s6, %s661_s24  ;;  %p665_p6 = scmp.lt.u32.totalorder %s661_s24, %s799_s6 }
 0x23e   :  { %p667_p7 = pnand %p665_p6, %p662_p5 }
 0x240   :  { %670 = shalt.err (!%p667_p7)
}
 0x241   :  { %571 = dma.vmem_to_hbm [thread:$0]  %s569_s19, 16, %s799_s6, [#allocation3]  }
 0x242   :  { %671 = dma.done.wait [#allocation3], 16  }
 0x243   :  { %672 = vsyncadd [#allocation3], 4294967280 }
 0x244   :  { %575 = vsyncpa [#allocation3], 1 }

</bundles_post_ra>
